<compile_context>
chip_gen: v7x
topology: tpu7x:2x2x1
jax: 0.10.0
libtpu: 0.0.40
codegen_flags: <defaults>
</compile_context>

<pallas_src>
import functools

import jax
import jax.numpy as jnp
from jax.experimental import pallas as pl
from jax.experimental.pallas import tpu as pltpu


def _round_up(x: int, m: int) -> int:
    return ((x + m - 1) // m) * m


def _vmem_capacity_bytes() -> int:
    """Generation-aware VMEM capacity; conservative fallback if query fails."""
    try:
        return int(pltpu.get_tpu_info().vmem_capacity_bytes)
    except Exception:
        return 64 * 1024 * 1024  # v7x per-TC size; safe lower bound everywhere


def prepare_ffn_params(w1, b1, w2, b2, compute_dtype=jnp.bfloat16):
    """Pad to lane-friendly sizes and cast ONCE (outside the per-call hot path).

    w1: [d_model, d_ff]  (x @ w1 convention)
    b1: [d_ff]
    w2: [d_ff, d_model]
    b2: [d_model]

    Zero padding is exact through both matmuls: padded b1 entries are 0 so
    ReLU(0) = 0, and padded w2 rows are 0, so padded columns contribute nothing.
    """
    d_model, d_ff = w1.shape
    dm_p = _round_up(d_model, 128)
    df_p = _round_up(d_ff, 128)
    w1p = jnp.pad(w1, ((0, dm_p - d_model), (0, df_p - d_ff))).astype(compute_dtype)
    w2p = jnp.pad(w2, ((0, df_p - d_ff), (0, dm_p - d_model))).astype(compute_dtype)
    b1p = jnp.pad(b1, (0, df_p - d_ff)).astype(jnp.float32).reshape(1, df_p)
    b2p = jnp.pad(b2, (0, dm_p - d_model)).astype(jnp.float32).reshape(1, dm_p)
    return w1p, b1p, w2p, b2p


# ----------------------------- kernels --------------------------------------


def ffn_resident_kernel(x_ref, w1_ref, b1_ref, w2_ref, b2_ref, o_ref):
    """Weights fully VMEM-resident; grid over row tiles only."""
    h = jnp.dot(x_ref[...], w1_ref[...], preferred_element_type=jnp.float32)
    h = jnp.maximum(h + b1_ref[...], 0.0)
    # Dropout: identity (inference mode).
    out = jnp.dot(h.astype(w2_ref.dtype), w2_ref[...],
                  preferred_element_type=jnp.float32)
    o_ref[...] = (out + b2_ref[...]).astype(o_ref.dtype)


def ffn_tiled_kernel_f32out(x_ref, w1_ref, b1_ref, w2_ref, b2_ref, o_ref):
    """d_ff-tiled path, f32 output: accumulate directly into resident o_ref."""
    f = pl.program_id(1)

    @pl.when(f == 0)
    def _():
        o_ref[...] = jnp.zeros_like(o_ref)

    h = jnp.dot(x_ref[...], w1_ref[...], preferred_element_type=jnp.float32)
    h = jnp.maximum(h + b1_ref[...], 0.0)
    # Dropout: identity (inference mode).
    o_ref[...] += jnp.dot(h.astype(w2_ref.dtype), w2_ref[...],
                          preferred_element_type=jnp.float32)

    @pl.when(f == pl.num_programs(1) - 1)
    def _():
        o_ref[...] += b2_ref[...]


def ffn_tiled_kernel(x_ref, w1_ref, b1_ref, w2_ref, b2_ref, o_ref, acc_ref):
    """d_ff-tiled path, generic output dtype: f32 scratch accumulator."""
    f = pl.program_id(1)

    @pl.when(f == 0)
    def _():
        acc_ref[...] = jnp.zeros_like(acc_ref)

    h = jnp.dot(x_ref[...], w1_ref[...], preferred_element_type=jnp.float32)
    h = jnp.maximum(h + b1_ref[...], 0.0)
    # Dropout: identity (inference mode).
    acc_ref[...] += jnp.dot(h.astype(w2_ref.dtype), w2_ref[...],
                            preferred_element_type=jnp.float32)

    @pl.when(f == pl.num_programs(1) - 1)
    def _():
        o_ref[...] = (acc_ref[...] + b2_ref[...]).astype(o_ref.dtype)


# ----------------------------- config ---------------------------------------


def _pick_tm(candidates, fits):
    for tm in candidates:
        if fits(tm):
            return tm
    return candidates[-1]


def _select_config(M, dm_p, df_p, out_itemsize, vmem_cap, force_tiled=False):
    """Choose path (weights-resident vs d_ff-tiled) and tile sizes for this chip."""
    budget = int(vmem_cap * 0.8)
    bf16 = 2
    misc = 2 * 1024 * 1024 + (df_p + dm_p) * 4  # biases + compiler headroom

    m_pad8 = _round_up(M, 8)
    tm_candidates = [t for t in (1024, 768, 512, 384, 256, 192, 128, 64, 32, 16, 8)
                     if t <= m_pad8]
    if not tm_candidates:
        tm_candidates = [m_pad8]

    # ---- weights-resident fast path: stream weights from HBM exactly once ----
    w_bytes = 2 * dm_p * df_p * bf16

    def resident_fits(tm):
        return (w_bytes
                + 2 * tm * dm_p * bf16            # double-buffered x tile
                + 2 * tm * dm_p * out_itemsize    # double-buffered out tile
                + tm * df_p * 4                   # f32 hidden intermediate
                + misc) <= budget

    if not force_tiled and resident_fits(tm_candidates[-1]):
        tm = _pick_tm(tm_candidates, resident_fits)
        return dict(resident=True, tm=tm, tf=df_p, vmem_limit=budget)

    # ---- d_ff-tiled path ----
    # tf: largest multiple-of-128 divisor of df_p not exceeding the target
    # (512 on big-VMEM v5e/v6e; 256 when VMEM is small, i.e. v7x) — no zero
    # columns are ever padded in beyond the 128-rounding.
    tf_target = 512 if vmem_cap > 96 * 1024 * 1024 else 256
    n128 = df_p // 128
    tf = 128
    for k in range(min(tf_target // 128, n128), 0, -1):
        if n128 % k == 0:
            tf = 128 * k
            break

    def tiled_fits(tm):
        acc_b = 0 if out_itemsize == 4 else tm * dm_p * 4  # f32-out accumulates in o_ref
        return (2 * dm_p * tf * bf16              # double-buffered w1 column block
                + 2 * tf * dm_p * bf16            # double-buffered w2 row block
                + 2 * tm * dm_p * bf16            # double-buffered x tile
                + 2 * tm * dm_p * out_itemsize    # double-buffered out tile
                + acc_b
                + tm * tf * 4                     # f32 hidden tile
                + misc) <= budget

    tm = _pick_tm(tm_candidates, tiled_fits)
    return dict(resident=False, tm=tm, tf=tf, vmem_limit=budget)


# ----------------------------- forward --------------------------------------


@functools.partial(jax.jit, static_argnames=("force_tiled",))
def feed_forward_block(x, w1p, b1p, w2p, b2p, *, force_tiled=False):
    """x: [B, S, d_model]; w1p/b1p/w2p/b2p: outputs of prepare_ffn_params()."""
    B, S, d_model = x.shape
    dm_p, df_p = w1p.shape
    M = B * S
    out_dtype = x.dtype
    compute_dtype = w1p.dtype
    out_itemsize = jnp.dtype(out_dtype).itemsize

    cfg = _select_config(M, dm_p, df_p, out_itemsize, _vmem_capacity_bytes(),
                         force_tiled=force_tiled)
    tm, tf = cfg["tm"], cfg["tf"]
    m_p = _round_up(M, tm)
    n_m = m_p // tm
    n_f = df_p // tf

    # Only activations are padded/cast per call; weights were prepared once.
    x2 = jnp.pad(x.reshape(M, d_model),
                 ((0, m_p - M), (0, dm_p - d_model))).astype(compute_dtype)

    # Advisory cost estimate so XLA can overlap neighbors with the kernel.
    weight_streams = 1 if cfg["resident"] else n_m
    w_itemsize = jnp.dtype(compute_dtype).itemsize
    bytes_accessed = (x2.size * w_itemsize
                      + m_p * dm_p * out_itemsize
                      + weight_streams * (w1p.size + w2p.size) * w_itemsize
                      + (b1p.size + b2p.size) * 4)
    cost = pl.CostEstimate(flops=4 * m_p * dm_p * df_p,
                           transcendentals=0,
                           bytes_accessed=int(bytes_accessed))

    cparams = pltpu.CompilerParams(
        dimension_semantics=("parallel",) if cfg["resident"]
        else ("parallel", "arbitrary"),
        vmem_limit_bytes=cfg["vmem_limit"],
    )

    if cfg["resident"]:
        out = pl.pallas_call(
            ffn_resident_kernel,
            out_shape=jax.ShapeDtypeStruct((m_p, dm_p), out_dtype),
            grid_spec=pltpu.PrefetchScalarGridSpec(
                num_scalar_prefetch=0,
                grid=(n_m,),
                in_specs=[
                    pl.BlockSpec((tm, dm_p), lambda i: (i, 0)),       # x tile
                    pl.BlockSpec((dm_p, df_p), lambda i: (0, 0)),     # w1 (resident)
                    pl.BlockSpec((1, df_p), lambda i: (0, 0)),        # b1 (resident)
                    pl.BlockSpec((df_p, dm_p), lambda i: (0, 0)),     # w2 (resident)
                    pl.BlockSpec((1, dm_p), lambda i: (0, 0)),        # b2 (resident)
                ],
                out_specs=pl.BlockSpec((tm, dm_p), lambda i: (i, 0)),
            ),
            compiler_params=cparams,
            cost_estimate=cost,
        )(x2, w1p, b1p, w2p, b2p)
    else:
        f32_out = jnp.dtype(out_dtype) == jnp.dtype(jnp.float32)
        kernel = ffn_tiled_kernel_f32out if f32_out else ffn_tiled_kernel
        scratch = [] if f32_out else [pltpu.VMEM((tm, dm_p), jnp.float32)]
        out = pl.pallas_call(
            kernel,
            out_shape=jax.ShapeDtypeStruct((m_p, dm_p), out_dtype),
            grid_spec=pltpu.PrefetchScalarGridSpec(
                num_scalar_prefetch=0,
                grid=(n_m, n_f),
                in_specs=[
                    pl.BlockSpec((tm, dm_p), lambda i, f: (i, 0)),    # x tile
                    pl.BlockSpec((dm_p, tf), lambda i, f: (0, f)),    # w1 column block
                    pl.BlockSpec((1, tf), lambda i, f: (0, f)),       # b1 slice (few KiB)
                    pl.BlockSpec((tf, dm_p), lambda i, f: (f, 0)),    # w2 row block
                    pl.BlockSpec((1, dm_p), lambda i, f: (0, 0)),     # b2 (resident)
                ],
                out_specs=pl.BlockSpec((tm, dm_p), lambda i, f: (i, 0)),
                scratch_shapes=scratch,
            ),
            compiler_params=cparams,
            cost_estimate=cost,
        )(x2, w1p, b1p, w2p, b2p)

    return out[:M, :d_model].reshape(B, S, d_model)


# ----------------------------- references -----------------------------------


def _reference_matched(x, w1, b1, w2, b2, compute_dtype=jnp.bfloat16):
    """Reference mirroring the kernel's precision (bf16 operands, f32 accumulate)."""
    xc = x.astype(compute_dtype)
    h = jnp.dot(xc, w1.astype(compute_dtype),
                preferred_element_type=jnp.float32) + b1
    h = jnp.maximum(h, 0.0)
    out = jnp.dot(h.astype(compute_dtype), w2.astype(compute_dtype),
                  preferred_element_type=jnp.float32) + b2
    return out.astype(x.dtype)


def _reference_f32(x, w1, b1, w2, b2):
    h = jnp.maximum(x @ w1 + b1, 0.0)
    return h @ w2 + b2


if __name__ == "__main__":
    B, S, d_model, d_ff = 2, 8, 32, 64

    key = jax.random.PRNGKey(0)
    kx, k1, k2, k3, k4 = jax.random.split(key, 5)

    # Deterministic parameter init (PyTorch-like uniform bounds).
    bound1 = 1.0 / (d_model ** 0.5)
    bound2 = 1.0 / (d_ff ** 0.5)
    x = jax.random.normal(kx, (B, S, d_model), dtype=jnp.float32)
    w1 = jax.random.uniform(k1, (d_model, d_ff), jnp.float32, -bound1, bound1)
    b1 = jax.random.uniform(k2, (d_ff,), jnp.float32, -bound1, bound1)
    w2 = jax.random.uniform(k3, (d_ff, d_model), jnp.float32, -bound2, bound2)
    b2 = jax.random.uniform(k4, (d_ff if False else d_model,), jnp.float32, -bound2, bound2)

    # Weight prep (pad + bf16 cast) happens ONCE, outside the hot path.
    params = prepare_ffn_params(w1, b1, w2, b2)

    # Weights-resident fast path (default for these sizes).
    out = feed_forward_block(x, *params)
    out = jax.block_until_ready(out)
    assert out.shape == (B, S, d_model)

    ref_bf16 = _reference_matched(x, w1, b1, w2, b2)
    assert jnp.allclose(out, ref_bf16, atol=2e-3, rtol=2e-3), \
        "mismatch vs bf16-matched reference (resident path)"
    ref_f32 = _reference_f32(x, w1, b1, w2, b2)
    assert jnp.allclose(out, ref_f32, atol=5e-2, rtol=5e-2), \
        "mismatch vs f32 reference (resident path)"

    # Also exercise the d_ff-tiled path (f32 accumulation directly into o_ref).
    out_t = feed_forward_block(x, *params, force_tiled=True)
    out_t = jax.block_until_ready(out_t)
    assert jnp.allclose(out_t, ref_bf16, atol=2e-3, rtol=2e-3), \
        "mismatch vs bf16-matched reference (tiled path)"

    print("KERNEL_OK")
</pallas_src>

<mosaic_0001>
module attributes {stable_mosaic.version = 11 : i64} {
  func.func @ffn_resident_kernel(%arg0: i32, %arg1: memref<16x128xbf16, #tpu.memory_space<vmem>>, %arg2: memref<128x128xbf16, #tpu.memory_space<vmem>>, %arg3: memref<1x128xf32, #tpu.memory_space<vmem>>, %arg4: memref<128x128xbf16, #tpu.memory_space<vmem>>, %arg5: memref<1x128xf32, #tpu.memory_space<vmem>>, %arg6: memref<16x128xf32, #tpu.memory_space<vmem>>) attributes {dimension_semantics = [#tpu.dimension_semantics<parallel>], iteration_bounds = array<i64: 1>, scalar_prefetch = 0 : i64, scratch_operands = 0 : i64, tpu.core_type = #tpu.core_type<tc>, window_params = [{transform_indices = @transform_0, window_bounds = array<i64: 16, 128>}, {pipeline_mode = #tpu.pipeline_mode<synchronous>, transform_indices = @transform_1, window_bounds = array<i64: 128, 128>}, {pipeline_mode = #tpu.pipeline_mode<synchronous>, transform_indices = @transform_2, window_bounds = array<i64: 1, 128>}, {pipeline_mode = #tpu.pipeline_mode<synchronous>, transform_indices = @transform_3, window_bounds = array<i64: 128, 128>}, {pipeline_mode = #tpu.pipeline_mode<synchronous>, transform_indices = @transform_4, window_bounds = array<i64: 1, 128>}, {transform_indices = @transform_5, window_bounds = array<i64: 16, 128>}]} {
    %c0 = arith.constant 0 : index
    %c0_0 = arith.constant 0 : index
    %0 = vector.load %arg1[%c0, %c0_0] : memref<16x128xbf16, #tpu.memory_space<vmem>>, vector<16x128xbf16>
    %c0_1 = arith.constant 0 : index
    %c0_2 = arith.constant 0 : index
    %1 = vector.load %arg2[%c0_1, %c0_2] : memref<128x128xbf16, #tpu.memory_space<vmem>>, vector<128x128xbf16>
    %cst = arith.constant dense<0.000000e+00> : vector<16x128xf32>
    %2 = tpu.matmul %0, %1, %cst {dimension_numbers = #tpu.dot_dimension_numbers<[1], [0], [0], [1], [0, 0, 1, 1], [], []>} : vector<16x128xbf16>, vector<128x128xbf16>, vector<16x128xf32> -> vector<16x128xf32>
    %c0_3 = arith.constant 0 : index
    %c0_4 = arith.constant 0 : index
    %3 = vector.load %arg3[%c0_3, %c0_4] : memref<1x128xf32, #tpu.memory_space<vmem>>, vector<1x128xf32>
    %4 = vector.broadcast %3 : vector<1x128xf32> to vector<16x128xf32>
    %5 = arith.addf %2, %4 : vector<16x128xf32>
    %cst_5 = arith.constant 0.000000e+00 : f32
    %6 = vector.broadcast %cst_5 : f32 to vector<16x128xf32>
    %7 = arith.maximumf %5, %6 : vector<16x128xf32>
    %8 = arith.truncf %7 : vector<16x128xf32> to vector<16x128xbf16>
    %c0_6 = arith.constant 0 : index
    %c0_7 = arith.constant 0 : index
    %9 = vector.load %arg4[%c0_6, %c0_7] : memref<128x128xbf16, #tpu.memory_space<vmem>>, vector<128x128xbf16>
    %cst_8 = arith.constant dense<0.000000e+00> : vector<16x128xf32>
    %10 = tpu.matmul %8, %9, %cst_8 {dimension_numbers = #tpu.dot_dimension_numbers<[1], [0], [0], [1], [0, 0, 1, 1], [], []>} : vector<16x128xbf16>, vector<128x128xbf16>, vector<16x128xf32> -> vector<16x128xf32>
    %c0_9 = arith.constant 0 : index
    %c0_10 = arith.constant 0 : index
    %11 = vector.load %arg5[%c0_9, %c0_10] : memref<1x128xf32, #tpu.memory_space<vmem>>, vector<1x128xf32>
    %12 = vector.broadcast %11 : vector<1x128xf32> to vector<16x128xf32>
    %13 = arith.addf %10, %12 : vector<16x128xf32>
    %c0_11 = arith.constant 0 : index
    %c0_12 = arith.constant 0 : index
    %14 = vector.load %arg6[%c0_11, %c0_12] : memref<16x128xf32, #tpu.memory_space<vmem>>, vector<16x128xf32>
    tpu.vector_store %arg6[%c0_11, %c0_12], %13 {strides = array<i32>} : memref<16x128xf32, #tpu.memory_space<vmem>>, vector<16x128xf32>,
    return
  }
  func.func @transform_0(%arg0: i32) -> (i32, i32) {
    %c0_i32 = arith.constant 0 : i32
    %c0_i32_0 = arith.constant 0 : i32
    return %arg0, %c0_i32 : i32, i32
  }
  func.func @transform_1(%arg0: i32) -> (i32, i32) {
    %c0_i32 = arith.constant 0 : i32
    %c0_i32_0 = arith.constant 0 : i32
    %c0_i32_1 = arith.constant 0 : i32
    return %c0_i32, %c0_i32_0 : i32, i32
  }
  func.func @transform_2(%arg0: i32) -> (i32, i32) {
    %c0_i32 = arith.constant 0 : i32
    %c0_i32_0 = arith.constant 0 : i32
    %c0_i32_1 = arith.constant 0 : i32
    return %c0_i32, %c0_i32_0 : i32, i32
  }
  func.func @transform_3(%arg0: i32) -> (i32, i32) {
    %c0_i32 = arith.constant 0 : i32
    %c0_i32_0 = arith.constant 0 : i32
    %c0_i32_1 = arith.constant 0 : i32
    return %c0_i32, %c0_i32_0 : i32, i32
  }
  func.func @transform_4(%arg0: i32) -> (i32, i32) {
    %c0_i32 = arith.constant 0 : i32
    %c0_i32_0 = arith.constant 0 : i32
    %c0_i32_1 = arith.constant 0 : i32
    return %c0_i32, %c0_i32_0 : i32, i32
  }
  func.func @transform_5(%arg0: i32) -> (i32, i32) {
    %c0_i32 = arith.constant 0 : i32
    %c0_i32_0 = arith.constant 0 : i32
    return %arg0, %c0_i32 : i32, i32
  }
}

</mosaic_0001>

<bundles_post_ra>
// kernel: feed_forward_block.1
= control target key start
LH: loop header
LB: loop body
LE: loop exit
PB: predicated region body
PF: predicated region fallthrough
CT: control target
= control target key end

     0   :  { %10 = vsyncpa [#allocation3], 0  ;;  %s515_s0 = inlined_call_operand.vmem [shape: bf16[16,128], index: 0, kind: input, shape index: {}]   ;;  %s516_s1 = inlined_call_operand.hbm [shape: bf16[128,128], index: 1, kind: input, shape index: {}]   ;;  %s517_s2 = inlined_call_operand.vmem [shape: f32[1,128], index: 2, kind: input, shape index: {}]   ;;  %s518_s3 = inlined_call_operand.hbm [shape: bf16[128,128], index: 3, kind: input, shape index: {}]   ;;  %s519_s4 = inlined_call_operand.vmem [shape: f32[1,128], index: 4, kind: input, shape index: {}]   ;;  %s520_s5 = inlined_call_operand.vmem [shape: f32[16,128], index: 5, kind: output, shape index: {}]  }
   0x1   :  { %11 = vsyncpa [#allocation5], 0  ;;  %s440_s18 = smov [#allocation2]   ;;  %s392_s22 = scalar_lea.hbm %s516_s1, 1024 }
   0x2   :  { %s19_s19 = sshll.u32 %s440_s18, 4  ;;  %p393_p0 = scmp.ne.s32.totalorder %s516_s1, %s392_s22  ;;  %s20_s19 = int_to_ptr.vmem [resolvable:$true] %s19_s19 }
   0x3   :  { %p396_p1 = scmp.lt.u32.totalorder %s392_s22, %s516_s1 }
   0x5   :  { %p398_p2 = pnand %p396_p1, %p393_p0 }
   0x7   :  { %401 = shalt.err (!%p398_p2)
}
   0x8   :  { %s402_s27 = scalar_lea.vmem %s20_s19, 1024  ;;  %p407_p4 = scmp.lt.s32.totalorder %s20_s19, %s20_s19 }
   0x9   :  { %p403_p3 = scmp.ne.s32.totalorder %s20_s19, %s402_s27  ;;  %p408_p5 = scmp.lt.s32.totalorder %s402_s27, %s402_s27 }
   0xb   :  { %p409_p6 = por %p408_p5, %p407_p4 }
   0xd   :  { %p410_p7 = pnand %p409_p6, %p403_p3 }
   0xf   :  { %413 = shalt.err (!%p410_p7)
}
  0x10   :  { %s441_s28 = smov 64   ;;  %s442_s29 = smov 4  }
  0x11   :  { %25 = dma.hbm_to_vmem [thread:$0]  %s516_s1, 1024, %s20_s19, [#allocation3], %s441_s28, %s441_s28, %s442_s29  }
  0x12   :  { %s443_s7 = smov [#allocation4]   ;;  %s414_s11 = scalar_lea.hbm %s518_s3, 1024 }
  0x13   :  { %s33_s8 = sshll.u32 %s443_s7, 4  ;;  %p415_p8 = scmp.ne.s32.totalorder %s518_s3, %s414_s11  ;;  %s34_s8 = int_to_ptr.vmem [resolvable:$true] %s33_s8 }
  0x14   :  { %p418_p9 = scmp.lt.u32.totalorder %s414_s11, %s518_s3 }
  0x16   :  { %p420_p10 = pnand %p418_p9, %p415_p8 }
  0x18   :  { %423 = shalt.err (!%p420_p10)
}
  0x19   :  { %s424_s16 = scalar_lea.vmem %s34_s8, 1024  ;;  %p429_p12 = scmp.lt.s32.totalorder %s34_s8, %s34_s8 }
  0x1a   :  { %p425_p11 = scmp.ne.s32.totalorder %s34_s8, %s424_s16  ;;  %p430_p13 = scmp.lt.s32.totalorder %s424_s16, %s424_s16 }
  0x1c   :  { %p431_p0 = por %p430_p13, %p429_p12 }
  0x1e   :  { %p432_p1 = pnand %p431_p0, %p425_p11 }
  0x20   :  { %435 = shalt.err (!%p432_p1)
}
  0x21   :  { %39 = dma.hbm_to_vmem [thread:$0]  %s518_s3, 1024, %s34_s8, [#allocation5], %s441_s28, %s441_s28, %s442_s29  }
  0x22   :  { %436 = dma.done.wait [#allocation3], 1024  }
  0x23   :  { %437 = vsyncadd [#allocation3], 4294966272 }
  0x24   :  { %438 = dma.done.wait [#allocation5], 1024  }
  0x25   :  { %439 = vsyncadd [#allocation5], 4294966272  ;;  %v444_v0 = vmov 0.0   ;;  %vm445_vm0 = vmmov 0   ;;  %v375_v1 = vld [vmem:[#allocation2] sm:$0xff]   ;;  %v376_v2 = vld [vmem:[#allocation2 + $0x8] sm:$0xff]  }
  0x26   :  { %329 = vmatprep.subr.bf16.mxu0 %v444_v0  ;;  %345 = vmatprep.mubr.msk.bf16.mxu0 %vm445_vm0, %v444_v0  ;;  %v377_v3 = vld [vmem:[#allocation2 + $0x10] sm:$0xff]   ;;  %v384_v4 = vld [vmem:[#allocation4] sm:$0xff]   ;;  %v378_v5 = vld [vmem:[#allocation2 + $0x18] sm:$0xff]  }
  0x27   :  { %349 = vmatprep.subr.bf16.mxu1 %v444_v0  ;;  %365 = vmatprep.mubr.msk.bf16.mxu1 %vm445_vm0, %v444_v0  ;;  %v385_v6 = vld [vmem:[#allocation4 + $0x8] sm:$0xff]   ;;  %v379_v7 = vld [vmem:[#allocation2 + $0x20] sm:$0xff]   ;;  %v386_v8 = vld [vmem:[#allocation4 + $0x10] sm:$0xff]  }
  0x28   :  { %330 = vmatpush3.bf16.msra.mxu0 %v375_v1  ;;  %350 = vmatpush3.bf16.msra.mxu1 %v384_v4  ;;  %v380_v9 = vld [vmem:[#allocation2 + $0x28] sm:$0xff]   ;;  %v387_v10 = vld [vmem:[#allocation4 + $0x18] sm:$0xff]   ;;  %v381_v11 = vld [vmem:[#allocation2 + $0x30] sm:$0xff]  }
  0x29   :  { %331 = vmatprep.subr.bf16.mxu0 %v444_v0  ;;  %351 = vmatprep.subr.bf16.mxu1 %v444_v0  ;;  %v388_v12 = vld [vmem:[#allocation4 + $0x20] sm:$0xff]   ;;  %v382_v13 = vld [vmem:[#allocation2 + $0x38] sm:$0xff]   ;;  %v389_v14 = vld [vmem:[#allocation4 + $0x28] sm:$0xff]  }
  0x2a   :  { %v383_v15 = vld [vmem:[%s515_s0] sm:$0xff]   ;;  %v390_v16 = vld [vmem:[#allocation4 + $0x30] sm:$0xff]   ;;  %v391_v17 = vld [vmem:[#allocation4 + $0x38] sm:$0xff]  }
  0x2b   :  { %v292_v18 = vld [vmem:[%s517_s2] ss:$0 sm:$0xff] }
  0x2c   :  { %332 = vmatpush3.bf16.msra.mxu0 %v376_v2  ;;  %352 = vmatpush3.bf16.msra.mxu1 %v385_v6  ;;  %v302_v28 = vld [vmem:[%s519_s4] ss:$0 sm:$0xff] }
  0x2d   :  { %333 = vmatprep.subr.bf16.mxu0 %v444_v0  ;;  %353 = vmatprep.subr.bf16.mxu1 %v444_v0 }
  0x30   :  { %334 = vmatpush3.bf16.msra.mxu0 %v377_v3  ;;  %354 = vmatpush3.bf16.msra.mxu1 %v386_v8 }
  0x31   :  { %335 = vmatprep.subr.bf16.mxu0 %v444_v0  ;;  %355 = vmatprep.subr.bf16.mxu1 %v444_v0 }
  0x34   :  { %336 = vmatpush3.bf16.msra.mxu0 %v378_v5  ;;  %356 = vmatpush3.bf16.msra.mxu1 %v387_v10 }
  0x35   :  { %337 = vmatprep.subr.bf16.mxu0 %v444_v0  ;;  %357 = vmatprep.subr.bf16.mxu1 %v444_v0 }
  0x38   :  { %338 = vmatpush3.bf16.msra.mxu0 %v379_v7  ;;  %358 = vmatpush3.bf16.msra.mxu1 %v388_v12 }
  0x39   :  { %339 = vmatprep.subr.bf16.mxu0 %v444_v0  ;;  %359 = vmatprep.subr.bf16.mxu1 %v444_v0 }
  0x3c   :  { %340 = vmatpush3.bf16.msra.mxu0 %v380_v9  ;;  %360 = vmatpush3.bf16.msra.mxu1 %v389_v14 }
  0x3d   :  { %341 = vmatprep.subr.bf16.mxu0 %v444_v0  ;;  %361 = vmatprep.subr.bf16.mxu1 %v444_v0 }
  0x40   :  { %342 = vmatpush3.bf16.msra.mxu0 %v381_v11  ;;  %362 = vmatpush3.bf16.msra.mxu1 %v390_v16 }
  0x41   :  { %343 = vmatprep.subr.bf16.mxu0 %v444_v0  ;;  %363 = vmatprep.subr.bf16.mxu1 %v444_v0 }
  0x44   :  { %344 = vmatpush3.bf16.msra.mxu0 %v382_v13  ;;  %364 = vmatpush3.bf16.msra.mxu1 %v391_v17 }
  0x47   :  { %346 = vmatmul.mubr.bf16.vlgmr.msra.gmra.mrb[0].mxu0 %v383_v15 }
 0x11a   :  { %v162_v19 = vpop.f32.mrb[0].mxu0 }
 0x11b   :  { %v163_v20 = vadd.f32 %v292_v18, %v162_v19  ;;  %v347_v21 = vpop.f32.mrb[1].mxu0 }
 0x11c   :  { %v165_v22 = vpop.f32.mrb[2].mxu0 }
 0x11d   :  { %v166_v23 = vadd.f32 %v292_v18, %v165_v22  ;;  %v348_v24 = vpop.f32.mrb[3].mxu0  ;;  %v169_v25 = vmax.f32 %v163_v20, 0.0 }
 0x11f   :  { %v170_v26 = vmax.f32 %v166_v23, 0.0 }
 0x121   :  { %v171_v27 = vpack.c.bf16 %v170_v26, %v169_v25 }
 0x123   :  { %366 = vmatmul.mubr.bf16.vlgmr.msra.gmra.mrb[0].mxu1 %v171_v27 }
 0x1f6   :  { %v277_v29 = vpop.f32.mrb[0].mxu1 }
 0x1f7   :  { %v278_v30 = vadd.f32 %v302_v28, %v277_v29  ;;  %v367_v31 = vpop.f32.mrb[1].mxu1 }
 0x1f8   :  { %v280_v32 = vpop.f32.mrb[2].mxu1 }
 0x1f9   :  { %284 = vst [vmem:[%s520_s5] sm:$0xff] %v278_v30  ;;  %v281_v33 = vadd.f32 %v302_v28, %v280_v32  ;;  %v368_v34 = vpop.f32.mrb[3].mxu1 }
 0x1fb   :  { %285 = vst [vmem:[%s520_s5 + $0x8] sm:$0xff] %v281_v33 }
 0x1fc   :  { %290 = vsyncpa [#allocation3], 1 }
 0x1fd   :  { %291 = vsyncpa [#allocation5], 1 }

</bundles_post_ra>
